<compile_context>
chip_gen: v5e
topology: v5e:2x2
jax: 0.10.0
libtpu: 0.0.40
codegen_flags: <defaults>
</compile_context>

<pallas_src>
import functools
import math

import jax
import jax.numpy as jnp
from jax import lax
from jax.experimental import pallas as pl
from jax.experimental.pallas import tpu as pltpu

LN_EPS = 1e-5


def _round_up(x, m):
    return ((x + m - 1) // m) * m


def _vmem_budget_bytes():
    try:
        return int(pltpu.get_tpu_info().vmem_capacity_bytes)
    except Exception:
        return 64 * 1024 * 1024      # conservative: fits every generation


def _vmem_limit_bytes():
    return min(int(_vmem_budget_bytes() * 3 // 4), 100 * 1024 * 1024)


def _largest_tile(total, cap, quantum):
    """Largest multiple of `quantum` that divides `total` and is <= cap."""
    t = min(cap, total)
    t = max(quantum, (t // quantum) * quantum)
    while t > quantum and total % t:
        t -= quantum
    return total if total % t else t


def _layer_norm(x, gamma, beta):
    # x: (M, C) f32; gamma/beta: (1, C). Matches torch.nn.LayerNorm (eps=1e-5).
    mean = jnp.mean(x, axis=-1, keepdims=True)
    var = jnp.mean(jnp.square(x - mean), axis=-1, keepdims=True)
    inv = lax.rsqrt(var + LN_EPS)
    return (x - mean) * inv * gamma + beta


def _gelu_exact(x):
    # torch.nn.GELU() default (erf formulation).
    return 0.5 * x * (1.0 + lax.erf(x * (1.0 / math.sqrt(2.0))))


# --------------------------------------------------------------------------- #
# Kernel 1: y = x + proj(attention(norm1(x)))                                 #
#   grid = (B, N // tq); K/V computed once per batch into VMEM scratch.       #
# --------------------------------------------------------------------------- #
def _attn_block_kernel(x_ref, g1_ref, be1_ref, wqkv_ref, bqkv_ref,
                       wproj_ref, bproj_ref, o_ref,
                       k_sc, v_sc, q_sc, oc_sc,
                       *, num_heads, head_dim, tq):
    qi = pl.program_id(1)
    C = num_heads * head_dim
    scale = head_dim ** (-0.5)

    g1 = g1_ref[...]
    be1 = be1_ref[...]
    x_view = x_ref.at[0]                       # (N, C) ref view (resident per b)

    # --- once per batch step: full-sequence LN + K/V projection -> scratch ---
    @pl.when(qi == 0)
    def _():
        x_all = x_view[...].astype(jnp.float32)                    # (N, C)
        xn = _layer_norm(x_all, g1, be1).astype(jnp.bfloat16)
        kv = jnp.dot(xn, wqkv_ref[:, C:],
                     preferred_element_type=jnp.float32)           # (N, 2C)
        kv = (kv + bqkv_ref[:, C:]).astype(jnp.bfloat16)
        for h in range(num_heads):             # copy-only head split (no matmul)
            k_sc[h] = kv[:, h * head_dim:(h + 1) * head_dim]
            v_sc[h] = kv[:, C + h * head_dim:C + (h + 1) * head_dim]

    # --- per query tile -------------------------------------------------------
    row0 = pl.multiple_of(qi * tq, tq)
    x_q = x_view[pl.ds(row0, tq), :].astype(jnp.float32)            # (tq, C)
    xn_q = _layer_norm(x_q, g1, be1).astype(jnp.bfloat16)
    qh = jnp.dot(xn_q, wqkv_ref[:, :C],
                 preferred_element_type=jnp.float32)                # (tq, C)
    qh = (qh + bqkv_ref[:, :C]).astype(jnp.bfloat16)
    for h in range(num_heads):                 # copy-only head split
        q_sc[h] = qh[:, h * head_dim:(h + 1) * head_dim]

    # Batched (over heads) attention: one dot_general for S, one for P@V.
    s = jnp.einsum('hqd,hkd->hqk', q_sc[...], k_sc[...],
                   preferred_element_type=jnp.float32) * scale      # (H, tq, N)
    s = s - jnp.max(s, axis=-1, keepdims=True)
    p = jnp.exp(s)
    p = p * pl.reciprocal(jnp.sum(p, axis=-1, keepdims=True), approx=True)
    o3 = jnp.einsum('hqk,hkd->hqd', p.astype(jnp.bfloat16), v_sc[...],
                    preferred_element_type=jnp.float32)              # (H, tq, Dh)

    # Assemble head outputs into (tq, C) and do ONE full-contraction projection.
    for h in range(num_heads):
        oc_sc[:, h * head_dim:(h + 1) * head_dim] = o3[h].astype(jnp.bfloat16)
    out = x_q + jnp.dot(oc_sc[...], wproj_ref[...],
                        preferred_element_type=jnp.float32) + bproj_ref[...]
    o_ref[0] = out.astype(o_ref.dtype)


def attention_block(x, g1, be1, wqkv, bqkv, wproj, bproj, *, num_heads, tq=None):
    B, N, C = x.shape
    head_dim = C // num_heads
    if tq is None:
        tq = _largest_tile(N, 256, 8)
    nq = N // tq

    kernel = functools.partial(_attn_block_kernel, num_heads=num_heads,
                               head_dim=head_dim, tq=tq)
    flops = B * (8 * N * C * C + 4 * N * N * C)
    bytes_accessed = (4 * 2 * B * N * C + 2 * (wqkv.size + wproj.size)
                      + 4 * (bqkv.size + bproj.size + 4 * C))

    return pl.pallas_call(
        kernel,
        out_shape=jax.ShapeDtypeStruct((B, N, C), x.dtype),
        grid_spec=pltpu.PrefetchScalarGridSpec(
            num_scalar_prefetch=0,
            grid=(B, nq),
            in_specs=[
                pl.BlockSpec((1, N, C), lambda b, q: (b, 0, 0)),    # x (per-b resident)
                pl.BlockSpec((1, C), lambda b, q: (0, 0)),          # gamma1
                pl.BlockSpec((1, C), lambda b, q: (0, 0)),          # beta1
                pl.BlockSpec((C, 3 * C), lambda b, q: (0, 0)),      # Wqkv bf16 (resident)
                pl.BlockSpec((1, 3 * C), lambda b, q: (0, 0)),      # bqkv
                pl.BlockSpec((C, C), lambda b, q: (0, 0)),          # Wproj bf16 (resident)
                pl.BlockSpec((1, C), lambda b, q: (0, 0)),          # bproj
            ],
            out_specs=pl.BlockSpec((1, tq, C), lambda b, q: (b, q, 0)),
            scratch_shapes=[
                pltpu.VMEM((num_heads, N, head_dim), jnp.bfloat16),   # K (per batch)
                pltpu.VMEM((num_heads, N, head_dim), jnp.bfloat16),   # V (per batch)
                pltpu.VMEM((num_heads, tq, head_dim), jnp.bfloat16),  # Q staging
                pltpu.VMEM((tq, C), jnp.bfloat16),                    # head-concat out
            ],
        ),
        compiler_params=pltpu.CompilerParams(
            dimension_semantics=("parallel", "arbitrary"),
            vmem_limit_bytes=_vmem_limit_bytes(),
        ),
        cost_estimate=pl.CostEstimate(
            flops=int(flops),
            transcendentals=int(B * num_heads * N * N),
            bytes_accessed=int(bytes_accessed)),
    )(x, g1, be1, wqkv, bqkv, wproj, bproj)


# --------------------------------------------------------------------------- #
# Kernel 2: out = y + fc2(GELU(fc1(norm2(y))))  over flattened token rows     #
# --------------------------------------------------------------------------- #
def _mlp_block_kernel(y_ref, g2_ref, be2_ref, w1_ref, b1_ref, w2_ref, b2_ref,
                      o_ref, xn_ref, acc_ref):
    h_idx = pl.program_id(1)

    @pl.when(h_idx == 0)
    def _():
        y = y_ref[...].astype(jnp.float32)
        xn_ref[...] = _layer_norm(y, g2_ref[...], be2_ref[...]).astype(jnp.bfloat16)
        acc_ref[...] = jnp.zeros_like(acc_ref)

    hid = jnp.dot(xn_ref[...], w1_ref[...],
                  preferred_element_type=jnp.float32) + b1_ref[...]
    g = _gelu_exact(hid).astype(jnp.bfloat16)
    acc_ref[...] += jnp.dot(g, w2_ref[...], preferred_element_type=jnp.float32)

    @pl.when(h_idx == pl.num_programs(1) - 1)
    def _():
        out = y_ref[...].astype(jnp.float32) + acc_ref[...] + b2_ref[...]
        o_ref[...] = out.astype(o_ref.dtype)


def mlp_block(y, g2, be2, w1, b1, w2, b2, *, tile_m=None, tile_h=None):
    M, C = y.shape
    hid_pad = w1.shape[1]                 # pre-padded (multiple of 128) at prepare time
    big_vmem = _vmem_budget_bytes() > 96 * 1024 * 1024   # v5e/v6e vs v7x
    if tile_m is None:
        tile_m = 512 if big_vmem else 256
    if tile_h is None:
        tile_h = 2048 if big_vmem else 1024
    tile_h = _largest_tile(hid_pad, tile_h, 128)
    m_pad = _round_up(M, 8)
    tile_m = min(tile_m, m_pad)
    if m_pad % tile_m:
        m_pad = _round_up(m_pad, tile_m)

    # Padded rows produce finite garbage through LayerNorm but are sliced off.
    y_p = jnp.pad(y, ((0, m_pad - M), (0, 0))) if m_pad != M else y

    grid = (m_pad // tile_m, hid_pad // tile_h)
    flops = 4 * m_pad * C * hid_pad
    bytes_accessed = (4 * 2 * m_pad * C + 2 * (w1.size + w2.size)
                      + 4 * (b1.size + b2.size + 2 * C))

    out = pl.pallas_call(
        _mlp_block_kernel,
        out_shape=jax.ShapeDtypeStruct((m_pad, C), y.dtype),
        grid_spec=pltpu.PrefetchScalarGridSpec(
            num_scalar_prefetch=0,
            grid=grid,
            in_specs=[
                pl.BlockSpec((tile_m, C), lambda i, h: (i, 0)),      # y row tile
                pl.BlockSpec((1, C), lambda i, h: (0, 0)),           # gamma2
                pl.BlockSpec((1, C), lambda i, h: (0, 0)),           # beta2
                pl.BlockSpec((C, tile_h), lambda i, h: (0, h)),      # w1 slab (bf16)
                pl.BlockSpec((1, tile_h), lambda i, h: (0, h)),      # b1 slab
                pl.BlockSpec((tile_h, C), lambda i, h: (h, 0)),      # w2 slab (bf16)
                pl.BlockSpec((1, C), lambda i, h: (0, 0)),           # b2 (finalize)
            ],
            out_specs=pl.BlockSpec((tile_m, C), lambda i, h: (i, 0)),
            scratch_shapes=[
                pltpu.VMEM((tile_m, C), jnp.bfloat16),   # norm2(y), computed once
                pltpu.VMEM((tile_m, C), jnp.float32),    # fc2 f32 accumulator
            ],
        ),
        compiler_params=pltpu.CompilerParams(
            dimension_semantics=("parallel", "arbitrary"),
            vmem_limit_bytes=_vmem_limit_bytes(),
        ),
        input_output_aliases={0: 0},          # out reuses y's buffer (residual add)
        cost_estimate=pl.CostEstimate(
            flops=int(flops),
            transcendentals=int(m_pad * hid_pad),
            bytes_accessed=int(bytes_accessed)),
    )(y_p, g2, be2, w1, b1, w2, b2)
    return out[:M]


# --------------------------------------------------------------------------- #
# Block forward + params + reference                                          #
# --------------------------------------------------------------------------- #
def block_forward(x, p, *, num_heads):
    B, N, C = x.shape
    y = attention_block(x, p["g1"], p["be1"], p["wqkv"], p["bqkv"],
                        p["wproj"], p["bproj"], num_heads=num_heads)
    out = mlp_block(y.reshape(B * N, C), p["g2"], p["be2"],
                    p["w1"], p["b1"], p["w2"], p["b2"])
    return out.reshape(B, N, C)


def init_block_params(key, dim, mlp_dim, dtype=jnp.float32):
    ks = jax.random.split(key, 8)

    def linear(kw, kb, fan_in, fan_out):
        bound = 1.0 / math.sqrt(fan_in)
        w = jax.random.uniform(kw, (fan_in, fan_out), dtype, -bound, bound)
        b = jax.random.uniform(kb, (1, fan_out), dtype, -bound, bound)
        return w, b

    wqkv, bqkv = linear(ks[0], ks[1], dim, 3 * dim)
    wproj, bproj = linear(ks[2], ks[3], dim, dim)
    w1, b1 = linear(ks[4], ks[5], dim, mlp_dim)
    w2, b2 = linear(ks[6], ks[7], mlp_dim, dim)
    return dict(
        g1=jnp.ones((1, dim), dtype), be1=jnp.zeros((1, dim), dtype),
        g2=jnp.ones((1, dim), dtype), be2=jnp.zeros((1, dim), dtype),
        wqkv=wqkv, bqkv=bqkv, wproj=wproj, bproj=bproj,
        w1=w1, b1=b1, w2=w2, b2=b2)


def prepare_block_params(p):
    """One-time conversion to kernel layout: bf16 weights, padded MLP hidden."""
    hid = p["w1"].shape[1]
    hid_pad = _round_up(hid, 128)
    dh = hid_pad - hid
    w1 = jnp.pad(p["w1"], ((0, 0), (0, dh))) if dh else p["w1"]
    b1 = jnp.pad(p["b1"], ((0, 0), (0, dh))) if dh else p["b1"]
    w2 = jnp.pad(p["w2"], ((0, dh), (0, 0))) if dh else p["w2"]
    q = dict(p)
    q["wqkv"] = p["wqkv"].astype(jnp.bfloat16)
    q["wproj"] = p["wproj"].astype(jnp.bfloat16)
    q["w1"] = w1.astype(jnp.bfloat16)
    q["b1"] = b1
    q["w2"] = w2.astype(jnp.bfloat16)
    return q


def block_reference(x, p, *, num_heads):
    B, N, C = x.shape
    dh = C // num_heads

    def ln(z, g, b):
        m = z.mean(-1, keepdims=True)
        v = ((z - m) ** 2).mean(-1, keepdims=True)
        return (z - m) / jnp.sqrt(v + LN_EPS) * g + b

    xn = ln(x, p["g1"], p["be1"])
    qkv = xn @ p["wqkv"] + p["bqkv"]
    qkv = qkv.reshape(B, N, 3, num_heads, dh).transpose(2, 0, 3, 1, 4)
    q, k, v = qkv[0], qkv[1], qkv[2]
    attn = (q @ jnp.swapaxes(k, -1, -2)) * (dh ** -0.5)
    attn = jax.nn.softmax(attn, axis=-1)
    out = jnp.swapaxes(attn @ v, 1, 2).reshape(B, N, C)
    x = x + out @ p["wproj"] + p["bproj"]
    xn2 = ln(x, p["g2"], p["be2"])
    h = xn2 @ p["w1"] + p["b1"]
    g = 0.5 * h * (1.0 + lax.erf(h / math.sqrt(2.0)))
    return x + g @ p["w2"] + p["b2"]


if __name__ == "__main__":
    B, N, C = 2, 8, 64
    num_heads = 4
    mlp_dim = 96

    key = jax.random.PRNGKey(0)
    kx, kp = jax.random.split(key)
    x = jax.random.normal(kx, (B, N, C), jnp.float32)
    params = init_block_params(kp, C, mlp_dim)
    kparams = prepare_block_params(params)

    out = block_forward(x, kparams, num_heads=num_heads)
    out = jax.block_until_ready(out)
    assert out.shape == (B, N, C)

    # Like-for-like reference: full-f32 math with the same bf16-rounded weights
    # (the bf16 MXU path is a deliberate precision trade-off per review).
    ref_params = dict(
        params,
        wqkv=kparams["wqkv"].astype(jnp.float32),
        wproj=kparams["wproj"].astype(jnp.float32),
        w1=kparams["w1"].astype(jnp.float32)[:, :mlp_dim],
        w2=kparams["w2"].astype(jnp.float32)[:mlp_dim, :],
    )
    ref = block_reference(x, ref_params, num_heads=num_heads)
    err = float(jnp.max(jnp.abs(out - ref)))
    assert jnp.allclose(out, ref, atol=2e-2, rtol=2e-2), f"mismatch: {err}"

    print("KERNEL_OK")
</pallas_src>

<mosaic_0001>
module attributes {stable_mosaic.version = 11 : i64} {
  func.func @_attn_block_kernel(%arg0: i32, %arg1: i32, %arg2: memref<1x8x64xf32, #tpu.memory_space<vmem>>, %arg3: memref<1x64xf32, #tpu.memory_space<vmem>>, %arg4: memref<1x64xf32, #tpu.memory_space<vmem>>, %arg5: memref<64x192xbf16, #tpu.memory_space<vmem>>, %arg6: memref<1x192xf32, #tpu.memory_space<vmem>>, %arg7: memref<64x64xbf16, #tpu.memory_space<vmem>>, %arg8: memref<1x64xf32, #tpu.memory_space<vmem>>, %arg9: memref<1x8x64xf32, #tpu.memory_space<vmem>>, %arg10: memref<4x8x16xbf16, #tpu.memory_space<vmem>>, %arg11: memref<4x8x16xbf16, #tpu.memory_space<vmem>>, %arg12: memref<4x8x16xbf16, #tpu.memory_space<vmem>>, %arg13: memref<8x64xbf16, #tpu.memory_space<vmem>>) attributes {dimension_semantics = [#tpu.dimension_semantics<parallel>, #tpu.dimension_semantics<arbitrary>], iteration_bounds = array<i64: 2, 1>, scalar_prefetch = 0 : i64, scratch_operands = 4 : i64, tpu.core_type = #tpu.core_type<tc>, window_params = [{transform_indices = @transform_0, window_bounds = array<i64: 1, 8, 64>}, {pipeline_mode = #tpu.pipeline_mode<synchronous>, transform_indices = @transform_1, window_bounds = array<i64: 1, 64>}, {pipeline_mode = #tpu.pipeline_mode<synchronous>, transform_indices = @transform_2, window_bounds = array<i64: 1, 64>}, {pipeline_mode = #tpu.pipeline_mode<synchronous>, transform_indices = @transform_3, window_bounds = array<i64: 64, 192>}, {pipeline_mode = #tpu.pipeline_mode<synchronous>, transform_indices = @transform_4, window_bounds = array<i64: 1, 192>}, {pipeline_mode = #tpu.pipeline_mode<synchronous>, transform_indices = @transform_5, window_bounds = array<i64: 64, 64>}, {pipeline_mode = #tpu.pipeline_mode<synchronous>, transform_indices = @transform_6, window_bounds = array<i64: 1, 64>}, {transform_indices = @transform_7, window_bounds = array<i64: 1, 8, 64>}]} {
    %c0 = arith.constant 0 : index
    %c0_0 = arith.constant 0 : index
    %0 = vector.load %arg3[%c0, %c0_0] : memref<1x64xf32, #tpu.memory_space<vmem>>, vector<1x64xf32>
    %c0_1 = arith.constant 0 : index
    %c0_2 = arith.constant 0 : index
    %1 = vector.load %arg4[%c0_1, %c0_2] : memref<1x64xf32, #tpu.memory_space<vmem>>, vector<1x64xf32>
    %c0_i32 = arith.constant 0 : i32
    %2 = arith.cmpi eq, %arg1, %c0_i32 : i32
    %3 = arith.extui %2 : i1 to i32
    %c0_i32_3 = arith.constant 0 : i32
    %c0_i32_4 = arith.constant 0 : i32
    %4 = arith.cmpi ne, %3, %c0_i32_4 : i32
    scf.if %4 {
      %100 = arith.index_cast %c0_i32_3 : i32 to index
      %c0_56 = arith.constant 0 : index
      %c0_57 = arith.constant 0 : index
      %101 = vector.load %arg2[%100, %c0_56, %c0_57] : memref<1x8x64xf32, #tpu.memory_space<vmem>>, vector<1x8x64xf32>
      %102 = vector.shape_cast %101 : vector<1x8x64xf32> to vector<8x64xf32>
      %cst_58 = arith.constant dense<0.000000e+00> : vector<8xf32>
      %103 = vector.multi_reduction <add>, %102, %cst_58 [1] : vector<8x64xf32> to vector<8xf32>
      %104 = vector.shape_cast %103 : vector<8xf32> to vector<8x1xf32>
      %cst_59 = arith.constant 6.400000e+01 : f32
      %105 = vector.broadcast %cst_59 : f32 to vector<8x1xf32>
      %106 = arith.divf %104, %105 : vector<8x1xf32>
      %107 = vector.broadcast %106 : vector<8x1xf32> to vector<8x64xf32>
      %108 = arith.subf %102, %107 : vector<8x64xf32>
      %109 = arith.mulf %108, %108 : vector<8x64xf32>
      %cst_60 = arith.constant dense<0.000000e+00> : vector<8xf32>
      %110 = vector.multi_reduction <add>, %109, %cst_60 [1] : vector<8x64xf32> to vector<8xf32>
      %111 = vector.shape_cast %110 : vector<8xf32> to vector<8x1xf32>
      %cst_61 = arith.constant 6.400000e+01 : f32
      %112 = vector.broadcast %cst_61 : f32 to vector<8x1xf32>
      %113 = arith.divf %111, %112 : vector<8x1xf32>
      %cst_62 = arith.constant 9.99999974E-6 : f32
      %114 = vector.broadcast %cst_62 : f32 to vector<8x1xf32>
      %115 = arith.addf %113, %114 : vector<8x1xf32>
      %116 = math.rsqrt %115 : vector<8x1xf32>
      %117 = vector.broadcast %106 : vector<8x1xf32> to vector<8x64xf32>
      %118 = arith.subf %102, %117 : vector<8x64xf32>
      %119 = vector.broadcast %116 : vector<8x1xf32> to vector<8x64xf32>
      %120 = arith.mulf %118, %119 : vector<8x64xf32>
      %121 = vector.broadcast %0 : vector<1x64xf32> to vector<8x64xf32>
      %122 = arith.mulf %120, %121 : vector<8x64xf32>
      %123 = vector.broadcast %1 : vector<1x64xf32> to vector<8x64xf32>
      %124 = arith.addf %122, %123 : vector<8x64xf32>
      %125 = arith.truncf %124 : vector<8x64xf32> to vector<8x64xbf16>
      %c0_63 = arith.constant 0 : index
      %c64 = arith.constant 64 : index
      %126 = vector.load %arg5[%c0_63, %c64] : memref<64x192xbf16, #tpu.memory_space<vmem>>, vector<64x128xbf16>
      %cst_64 = arith.constant dense<0.000000e+00> : vector<8x128xf32>
      %127 = tpu.matmul %125, %126, %cst_64 {dimension_numbers = #tpu.dot_dimension_numbers<[1], [0], [0], [1], [0, 0, 1, 1], [], []>} : vector<8x64xbf16>, vector<64x128xbf16>, vector<8x128xf32> -> vector<8x128xf32>
      %c0_65 = arith.constant 0 : index
      %c64_66 = arith.constant 64 : index
      %128 = vector.load %arg6[%c0_65, %c64_66] : memref<1x192xf32, #tpu.memory_space<vmem>>, vector<1x128xf32>
      %129 = vector.broadcast %128 : vector<1x128xf32> to vector<8x128xf32>
      %130 = arith.addf %127, %129 : vector<8x128xf32>
      %131 = arith.truncf %130 : vector<8x128xf32> to vector<8x128xbf16>
      %132 = vector.extract_strided_slice %131 {offsets = [0, 0], sizes = [8, 16], strides = [1, 1]} : vector<8x128xbf16> to vector<8x16xbf16>
      %c0_67 = arith.constant 0 : index
      %c0_68 = arith.constant 0 : index
      %c0_69 = arith.constant 0 : index
      %133 = vector.load %arg10[%c0_67, %c0_68, %c0_69] : memref<4x8x16xbf16, #tpu.memory_space<vmem>>, vector<1x8x16xbf16>
      %134 = vector.shape_cast %133 : vector<1x8x16xbf16> to vector<8x16xbf16>
      %135 = vector.shape_cast %132 : vector<8x16xbf16> to vector<1x8x16xbf16>
      tpu.vector_store %arg10[%c0_67, %c0_68, %c0_69], %135 {strides = array<i32>} : memref<4x8x16xbf16, #tpu.memory_space<vmem>>, vector<1x8x16xbf16>,
      %136 = vector.extract_strided_slice %131 {offsets = [0, 64], sizes = [8, 16], strides = [1, 1]} : vector<8x128xbf16> to vector<8x16xbf16>
      %c0_70 = arith.constant 0 : index
      %c0_71 = arith.constant 0 : index
      %c0_72 = arith.constant 0 : index
      %137 = vector.load %arg11[%c0_70, %c0_71, %c0_72] : memref<4x8x16xbf16, #tpu.memory_space<vmem>>, vector<1x8x16xbf16>
      %138 = vector.shape_cast %137 : vector<1x8x16xbf16> to vector<8x16xbf16>
      %139 = vector.shape_cast %136 : vector<8x16xbf16> to vector<1x8x16xbf16>
      tpu.vector_store %arg11[%c0_70, %c0_71, %c0_72], %139 {strides = array<i32>} : memref<4x8x16xbf16, #tpu.memory_space<vmem>>, vector<1x8x16xbf16>,
      %140 = vector.extract_strided_slice %131 {offsets = [0, 16], sizes = [8, 16], strides = [1, 1]} : vector<8x128xbf16> to vector<8x16xbf16>
      %c1_73 = arith.constant 1 : index
      %c0_74 = arith.constant 0 : index
      %c0_75 = arith.constant 0 : index
      %141 = vector.load %arg10[%c1_73, %c0_74, %c0_75] : memref<4x8x16xbf16, #tpu.memory_space<vmem>>, vector<1x8x16xbf16>
      %142 = vector.shape_cast %141 : vector<1x8x16xbf16> to vector<8x16xbf16>
      %143 = vector.shape_cast %140 : vector<8x16xbf16> to vector<1x8x16xbf16>
      tpu.vector_store %arg10[%c1_73, %c0_74, %c0_75], %143 {strides = array<i32>} : memref<4x8x16xbf16, #tpu.memory_space<vmem>>, vector<1x8x16xbf16>,
      %144 = vector.extract_strided_slice %131 {offsets = [0, 80], sizes = [8, 16], strides = [1, 1]} : vector<8x128xbf16> to vector<8x16xbf16>
      %c1_76 = arith.constant 1 : index
      %c0_77 = arith.constant 0 : index
      %c0_78 = arith.constant 0 : index
      %145 = vector.load %arg11[%c1_76, %c0_77, %c0_78] : memref<4x8x16xbf16, #tpu.memory_space<vmem>>, vector<1x8x16xbf16>
      %146 = vector.shape_cast %145 : vector<1x8x16xbf16> to vector<8x16xbf16>
      %147 = vector.shape_cast %144 : vector<8x16xbf16> to vector<1x8x16xbf16>
      tpu.vector_store %arg11[%c1_76, %c0_77, %c0_78], %147 {strides = array<i32>} : memref<4x8x16xbf16, #tpu.memory_space<vmem>>, vector<1x8x16xbf16>,
      %148 = vector.extract_strided_slice %131 {offsets = [0, 32], sizes = [8, 16], strides = [1, 1]} : vector<8x128xbf16> to vector<8x16xbf16>
      %c2_79 = arith.constant 2 : index
      %c0_80 = arith.constant 0 : index
      %c0_81 = arith.constant 0 : index
      %149 = vector.load %arg10[%c2_79, %c0_80, %c0_81] : memref<4x8x16xbf16, #tpu.memory_space<vmem>>, vector<1x8x16xbf16>
      %150 = vector.shape_cast %149 : vector<1x8x16xbf16> to vector<8x16xbf16>
      %151 = vector.shape_cast %148 : vector<8x16xbf16> to vector<1x8x16xbf16>
      tpu.vector_store %arg10[%c2_79, %c0_80, %c0_81], %151 {strides = array<i32>} : memref<4x8x16xbf16, #tpu.memory_space<vmem>>, vector<1x8x16xbf16>,
      %152 = vector.extract_strided_slice %131 {offsets = [0, 96], sizes = [8, 16], strides = [1, 1]} : vector<8x128xbf16> to vector<8x16xbf16>
      %c2_82 = arith.constant 2 : index
      %c0_83 = arith.constant 0 : index
      %c0_84 = arith.constant 0 : index
      %153 = vector.load %arg11[%c2_82, %c0_83, %c0_84] : memref<4x8x16xbf16, #tpu.memory_space<vmem>>, vector<1x8x16xbf16>
      %154 = vector.shape_cast %153 : vector<1x8x16xbf16> to vector<8x16xbf16>
      %155 = vector.shape_cast %152 : vector<8x16xbf16> to vector<1x8x16xbf16>
      tpu.vector_store %arg11[%c2_82, %c0_83, %c0_84], %155 {strides = array<i32>} : memref<4x8x16xbf16, #tpu.memory_space<vmem>>, vector<1x8x16xbf16>,
      %156 = vector.extract_strided_slice %131 {offsets = [0, 48], sizes = [8, 16], strides = [1, 1]} : vector<8x128xbf16> to vector<8x16xbf16>
      %c3_85 = arith.constant 3 : index
      %c0_86 = arith.constant 0 : index
      %c0_87 = arith.constant 0 : index
      %157 = vector.load %arg10[%c3_85, %c0_86, %c0_87] : memref<4x8x16xbf16, #tpu.memory_space<vmem>>, vector<1x8x16xbf16>
      %158 = vector.shape_cast %157 : vector<1x8x16xbf16> to vector<8x16xbf16>
      %159 = vector.shape_cast %156 : vector<8x16xbf16> to vector<1x8x16xbf16>
      tpu.vector_store %arg10[%c3_85, %c0_86, %c0_87], %159 {strides = array<i32>} : memref<4x8x16xbf16, #tpu.memory_space<vmem>>, vector<1x8x16xbf16>,
      %160 = vector.extract_strided_slice %131 {offsets = [0, 112], sizes = [8, 16], strides = [1, 1]} : vector<8x128xbf16> to vector<8x16xbf16>
      %c3_88 = arith.constant 3 : index
      %c0_89 = arith.constant 0 : index
      %c0_90 = arith.constant 0 : index
      %161 = vector.load %arg11[%c3_88, %c0_89, %c0_90] : memref<4x8x16xbf16, #tpu.memory_space<vmem>>, vector<1x8x16xbf16>
      %162 = vector.shape_cast %161 : vector<1x8x16xbf16> to vector<8x16xbf16>
      %163 = vector.shape_cast %160 : vector<8x16xbf16> to vector<1x8x16xbf16>
      tpu.vector_store %arg11[%c3_88, %c0_89, %c0_90], %163 {strides = array<i32>} : memref<4x8x16xbf16, #tpu.memory_space<vmem>>, vector<1x8x16xbf16>,
    } else {
    }
    %c8_i32 = arith.constant 8 : i32
    %5 = arith.muli %arg1, %c8_i32 : i32
    %6 = tpu.assume_multiple %5, 8 : i32
    %c0_i32_5 = arith.constant 0 : i32
    %c0_i32_6 = arith.constant 0 : i32
    %c0_i32_7 = arith.constant 0 : i32
    %7 = tpu.memref_slice %arg2[%c0_i32_5, %c0_i32_6, %c0_i32_7] : memref<1x8x64xf32, #tpu.memory_space<vmem>> -> memref<1x8x64xf32, #tpu.memory_space<vmem>>
    %8 = tpu.memref_squeeze %7 : memref<1x8x64xf32, #tpu.memory_space<vmem>> -> memref<8x64xf32, #tpu.memory_space<vmem>>
    %9 = arith.index_cast %6 : i32 to index
    %c0_8 = arith.constant 0 : index
    %10 = vector.load %8[%9, %c0_8] : memref<8x64xf32, #tpu.memory_space<vmem>>, vector<8x64xf32>
    %cst = arith.constant dense<0.000000e+00> : vector<8xf32>
    %11 = vector.multi_reduction <add>, %10, %cst [1] : vector<8x64xf32> to vector<8xf32>
    %12 = vector.shape_cast %11 : vector<8xf32> to vector<8x1xf32>
    %cst_9 = arith.constant 6.400000e+01 : f32
    %13 = vector.broadcast %cst_9 : f32 to vector<8x1xf32>
    %14 = arith.divf %12, %13 : vector<8x1xf32>
    %15 = vector.broadcast %14 : vector<8x1xf32> to vector<8x64xf32>
    %16 = arith.subf %10, %15 : vector<8x64xf32>
    %17 = arith.mulf %16, %16 : vector<8x64xf32>
    %cst_10 = arith.constant dense<0.000000e+00> : vector<8xf32>
    %18 = vector.multi_reduction <add>, %17, %cst_10 [1] : vector<8x64xf32> to vector<8xf32>
    %19 = vector.shape_cast %18 : vector<8xf32> to vector<8x1xf32>
    %cst_11 = arith.constant 6.400000e+01 : f32
    %20 = vector.broadcast %cst_11 : f32 to vector<8x1xf32>
    %21 = arith.divf %19, %20 : vector<8x1xf32>
    %cst_12 = arith.constant 9.99999974E-6 : f32
    %22 = vector.broadcast %cst_12 : f32 to vector<8x1xf32>
    %23 = arith.addf %21, %22 : vector<8x1xf32>
    %24 = math.rsqrt %23 : vector<8x1xf32>
    %25 = vector.broadcast %14 : vector<8x1xf32> to vector<8x64xf32>
    %26 = arith.subf %10, %25 : vector<8x64xf32>
    %27 = vector.broadcast %24 : vector<8x1xf32> to vector<8x64xf32>
    %28 = arith.mulf %26, %27 : vector<8x64xf32>
    %29 = vector.broadcast %0 : vector<1x64xf32> to vector<8x64xf32>
    %30 = arith.mulf %28, %29 : vector<8x64xf32>
    %31 = vector.broadcast %1 : vector<1x64xf32> to vector<8x64xf32>
    %32 = arith.addf %30, %31 : vector<8x64xf32>
    %33 = arith.truncf %32 : vector<8x64xf32> to vector<8x64xbf16>
    %c0_13 = arith.constant 0 : index
    %c0_14 = arith.constant 0 : index
    %34 = vector.load %arg5[%c0_13, %c0_14] : memref<64x192xbf16, #tpu.memory_space<vmem>>, vector<64x64xbf16>
    %cst_15 = arith.constant dense<0.000000e+00> : vector<8x64xf32>
    %35 = tpu.matmul %33, %34, %cst_15 {dimension_numbers = #tpu.dot_dimension_numbers<[1], [0], [0], [1], [0, 0, 1, 1], [], []>} : vector<8x64xbf16>, vector<64x64xbf16>, vector<8x64xf32> -> vector<8x64xf32>
    %c0_16 = arith.constant 0 : index
    %c0_17 = arith.constant 0 : index
    %36 = vector.load %arg6[%c0_16, %c0_17] : memref<1x192xf32, #tpu.memory_space<vmem>>, vector<1x64xf32>
    %37 = vector.broadcast %36 : vector<1x64xf32> to vector<8x64xf32>
    %38 = arith.addf %35, %37 : vector<8x64xf32>
    %39 = arith.truncf %38 : vector<8x64xf32> to vector<8x64xbf16>
    %40 = vector.extract_strided_slice %39 {offsets = [0, 0], sizes = [8, 16], strides = [1, 1]} : vector<8x64xbf16> to vector<8x16xbf16>
    %c0_18 = arith.constant 0 : index
    %c0_19 = arith.constant 0 : index
    %c0_20 = arith.constant 0 : index
    %41 = vector.load %arg12[%c0_18, %c0_19, %c0_20] : memref<4x8x16xbf16, #tpu.memory_space<vmem>>, vector<1x8x16xbf16>
    %42 = vector.shape_cast %41 : vector<1x8x16xbf16> to vector<8x16xbf16>
    %43 = vector.shape_cast %40 : vector<8x16xbf16> to vector<1x8x16xbf16>
    tpu.vector_store %arg12[%c0_18, %c0_19, %c0_20], %43 {strides = array<i32>} : memref<4x8x16xbf16, #tpu.memory_space<vmem>>, vector<1x8x16xbf16>,
    %44 = vector.extract_strided_slice %39 {offsets = [0, 16], sizes = [8, 16], strides = [1, 1]} : vector<8x64xbf16> to vector<8x16xbf16>
    %c1 = arith.constant 1 : index
    %c0_21 = arith.constant 0 : index
    %c0_22 = arith.constant 0 : index
    %45 = vector.load %arg12[%c1, %c0_21, %c0_22] : memref<4x8x16xbf16, #tpu.memory_space<vmem>>, vector<1x8x16xbf16>
    %46 = vector.shape_cast %45 : vector<1x8x16xbf16> to vector<8x16xbf16>
    %47 = vector.shape_cast %44 : vector<8x16xbf16> to vector<1x8x16xbf16>
    tpu.vector_store %arg12[%c1, %c0_21, %c0_22], %47 {strides = array<i32>} : memref<4x8x16xbf16, #tpu.memory_space<vmem>>, vector<1x8x16xbf16>,
    %48 = vector.extract_strided_slice %39 {offsets = [0, 32], sizes = [8, 16], strides = [1, 1]} : vector<8x64xbf16> to vector<8x16xbf16>
    %c2 = arith.constant 2 : index
    %c0_23 = arith.constant 0 : index
    %c0_24 = arith.constant 0 : index
    %49 = vector.load %arg12[%c2, %c0_23, %c0_24] : memref<4x8x16xbf16, #tpu.memory_space<vmem>>, vector<1x8x16xbf16>
    %50 = vector.shape_cast %49 : vector<1x8x16xbf16> to vector<8x16xbf16>
    %51 = vector.shape_cast %48 : vector<8x16xbf16> to vector<1x8x16xbf16>
    tpu.vector_store %arg12[%c2, %c0_23, %c0_24], %51 {strides = array<i32>} : memref<4x8x16xbf16, #tpu.memory_space<vmem>>, vector<1x8x16xbf16>,
    %52 = vector.extract_strided_slice %39 {offsets = [0, 48], sizes = [8, 16], strides = [1, 1]} : vector<8x64xbf16> to vector<8x16xbf16>
    %c3 = arith.constant 3 : index
    %c0_25 = arith.constant 0 : index
    %c0_26 = arith.constant 0 : index
    %53 = vector.load %arg12[%c3, %c0_25, %c0_26] : memref<4x8x16xbf16, #tpu.memory_space<vmem>>, vector<1x8x16xbf16>
    %54 = vector.shape_cast %53 : vector<1x8x16xbf16> to vector<8x16xbf16>
    %55 = vector.shape_cast %52 : vector<8x16xbf16> to vector<1x8x16xbf16>
    tpu.vector_store %arg12[%c3, %c0_25, %c0_26], %55 {strides = array<i32>} : memref<4x8x16xbf16, #tpu.memory_space<vmem>>, vector<1x8x16xbf16>,
    %c0_27 = arith.constant 0 : index
    %c0_28 = arith.constant 0 : index
    %c0_29 = arith.constant 0 : index
    %56 = vector.load %arg12[%c0_27, %c0_28, %c0_29] : memref<4x8x16xbf16, #tpu.memory_space<vmem>>, vector<4x8x16xbf16>
    %c0_30 = arith.constant 0 : index
    %c0_31 = arith.constant 0 : index
    %c0_32 = arith.constant 0 : index
    %57 = vector.load %arg10[%c0_30, %c0_31, %c0_32] : memref<4x8x16xbf16, #tpu.memory_space<vmem>>, vector<4x8x16xbf16>
    "tpu.trace_start"() <{level = 10 : i32, message = "hqd,hkd->hqk"}> : () -> ()
    %cst_33 = arith.constant dense<0.000000e+00> : vector<4x8x8xf32>
    %58 = tpu.matmul %56, %57, %cst_33 {dimension_numbers = #tpu.dot_dimension_numbers<[2], [2], [1], [1], [0, 0, 0, 1, 1, 1], [0], [0]>} : vector<4x8x16xbf16>, vector<4x8x16xbf16>, vector<4x8x8xf32> -> vector<4x8x8xf32>
    "tpu.trace_stop"() : () -> ()
    %cst_34 = arith.constant 2.500000e-01 : f32
    %59 = vector.broadcast %cst_34 : f32 to vector<4x8x8xf32>
    %60 = arith.mulf %58, %59 : vector<4x8x8xf32>
    %cst_35 = arith.constant dense<0xFF800000> : vector<4x8xf32>
    %61 = vector.multi_reduction <maximumf>, %60, %cst_35 [2] : vector<4x8x8xf32> to vector<4x8xf32>
    %62 = vector.shape_cast %61 : vector<4x8xf32> to vector<4x8x1xf32>
    %63 = vector.broadcast %62 : vector<4x8x1xf32> to vector<4x8x8xf32>
    %64 = arith.subf %60, %63 : vector<4x8x8xf32>
    %65 = math.exp %64 : vector<4x8x8xf32>
    %cst_36 = arith.constant dense<0.000000e+00> : vector<4x8xf32>
    %66 = vector.multi_reduction <add>, %65, %cst_36 [2] : vector<4x8x8xf32> to vector<4x8xf32>
    %67 = vector.shape_cast %66 : vector<4x8xf32> to vector<4x8x1xf32>
    %68 = tpu.reciprocal %67 {approx = true} : vector<4x8x1xf32> -> vector<4x8x1xf32>
    %69 = vector.broadcast %68 : vector<4x8x1xf32> to vector<4x8x8xf32>
    %70 = arith.mulf %65, %69 : vector<4x8x8xf32>
    %71 = arith.truncf %70 : vector<4x8x8xf32> to vector<4x8x8xbf16>
    %c0_37 = arith.constant 0 : index
    %c0_38 = arith.constant 0 : index
    %c0_39 = arith.constant 0 : index
    %72 = vector.load %arg11[%c0_37, %c0_38, %c0_39] : memref<4x8x16xbf16, #tpu.memory_space<vmem>>, vector<4x8x16xbf16>
    "tpu.trace_start"() <{level = 10 : i32, message = "hqk,hkd->hqd"}> : () -> ()
    %cst_40 = arith.constant dense<0.000000e+00> : vector<4x8x16xf32>
    %73 = tpu.matmul %71, %72, %cst_40 {dimension_numbers = #tpu.dot_dimension_numbers<[2], [1], [1], [2], [0, 0, 0, 1, 1, 2], [0], [0]>} : vector<4x8x8xbf16>, vector<4x8x16xbf16>, vector<4x8x16xf32> -> vector<4x8x16xf32>
    "tpu.trace_stop"() : () -> ()
    %74 = vector.extract_strided_slice %73 {offsets = [0, 0, 0], sizes = [1, 8, 16], strides = [1, 1, 1]} : vector<4x8x16xf32> to vector<1x8x16xf32>
    %75 = vector.shape_cast %74 : vector<1x8x16xf32> to vector<8x16xf32>
    %76 = arith.truncf %75 : vector<8x16xf32> to vector<8x16xbf16>
    %c0_41 = arith.constant 0 : index
    %c0_42 = arith.constant 0 : index
    %77 = vector.load %arg13[%c0_41, %c0_42] : memref<8x64xbf16, #tpu.memory_space<vmem>>, vector<8x16xbf16>
    tpu.vector_store %arg13[%c0_41, %c0_42], %76 {strides = array<i32>} : memref<8x64xbf16, #tpu.memory_space<vmem>>, vector<8x16xbf16>,
    %78 = vector.extract_strided_slice %73 {offsets = [1, 0, 0], sizes = [1, 8, 16], strides = [1, 1, 1]} : vector<4x8x16xf32> to vector<1x8x16xf32>
    %79 = vector.shape_cast %78 : vector<1x8x16xf32> to vector<8x16xf32>
    %80 = arith.truncf %79 : vector<8x16xf32> to vector<8x16xbf16>
    %c0_43 = arith.constant 0 : index
    %c16 = arith.constant 16 : index
    %81 = vector.load %arg13[%c0_43, %c16] : memref<8x64xbf16, #tpu.memory_space<vmem>>, vector<8x16xbf16>
    tpu.vector_store %arg13[%c0_43, %c16], %80 {strides = array<i32>} : memref<8x64xbf16, #tpu.memory_space<vmem>>, vector<8x16xbf16>,
    %82 = vector.extract_strided_slice %73 {offsets = [2, 0, 0], sizes = [1, 8, 16], strides = [1, 1, 1]} : vector<4x8x16xf32> to vector<1x8x16xf32>
    %83 = vector.shape_cast %82 : vector<1x8x16xf32> to vector<8x16xf32>
    %84 = arith.truncf %83 : vector<8x16xf32> to vector<8x16xbf16>
    %c0_44 = arith.constant 0 : index
    %c32 = arith.constant 32 : index
    %85 = vector.load %arg13[%c0_44, %c32] : memref<8x64xbf16, #tpu.memory_space<vmem>>, vector<8x16xbf16>
    tpu.vector_store %arg13[%c0_44, %c32], %84 {strides = array<i32>} : memref<8x64xbf16, #tpu.memory_space<vmem>>, vector<8x16xbf16>,
    %86 = vector.extract_strided_slice %73 {offsets = [3, 0, 0], sizes = [1, 8, 16], strides = [1, 1, 1]} : vector<4x8x16xf32> to vector<1x8x16xf32>
    %87 = vector.shape_cast %86 : vector<1x8x16xf32> to vector<8x16xf32>
    %88 = arith.truncf %87 : vector<8x16xf32> to vector<8x16xbf16>
    %c0_45 = arith.constant 0 : index
    %c48 = arith.constant 48 : index
    %89 = vector.load %arg13[%c0_45, %c48] : memref<8x64xbf16, #tpu.memory_space<vmem>>, vector<8x16xbf16>
    tpu.vector_store %arg13[%c0_45, %c48], %88 {strides = array<i32>} : memref<8x64xbf16, #tpu.memory_space<vmem>>, vector<8x16xbf16>,
    %c0_46 = arith.constant 0 : index
    %c0_47 = arith.constant 0 : index
    %90 = vector.load %arg13[%c0_46, %c0_47] : memref<8x64xbf16, #tpu.memory_space<vmem>>, vector<8x64xbf16>
    %c0_48 = arith.constant 0 : index
    %c0_49 = arith.constant 0 : index
    %91 = vector.load %arg7[%c0_48, %c0_49] : memref<64x64xbf16, #tpu.memory_space<vmem>>, vector<64x64xbf16>
    %cst_50 = arith.constant dense<0.000000e+00> : vector<8x64xf32>
    %92 = tpu.matmul %90, %91, %cst_50 {dimension_numbers = #tpu.dot_dimension_numbers<[1], [0], [0], [1], [0, 0, 1, 1], [], []>} : vector<8x64xbf16>, vector<64x64xbf16>, vector<8x64xf32> -> vector<8x64xf32>
    %93 = arith.addf %10, %92 : vector<8x64xf32>
    %c0_51 = arith.constant 0 : index
    %c0_52 = arith.constant 0 : index
    %94 = vector.load %arg8[%c0_51, %c0_52] : memref<1x64xf32, #tpu.memory_space<vmem>>, vector<1x64xf32>
    %95 = vector.broadcast %94 : vector<1x64xf32> to vector<8x64xf32>
    %96 = arith.addf %93, %95 : vector<8x64xf32>
    %c0_53 = arith.constant 0 : index
    %c0_54 = arith.constant 0 : index
    %c0_55 = arith.constant 0 : index
    %97 = vector.load %arg9[%c0_53, %c0_54, %c0_55] : memref<1x8x64xf32, #tpu.memory_space<vmem>>, vector<1x8x64xf32>
    %98 = vector.shape_cast %97 : vector<1x8x64xf32> to vector<8x64xf32>
    %99 = vector.shape_cast %96 : vector<8x64xf32> to vector<1x8x64xf32>
    tpu.vector_store %arg9[%c0_53, %c0_54, %c0_55], %99 {strides = array<i32>} : memref<1x8x64xf32, #tpu.memory_space<vmem>>, vector<1x8x64xf32>,
    return
  }
  func.func @transform_0(%arg0: i32, %arg1: i32) -> (i32, i32, i32) {
    %c0_i32 = arith.constant 0 : i32
    %c0_i32_0 = arith.constant 0 : i32
    %c0_i32_1 = arith.constant 0 : i32
    return %arg0, %c0_i32, %c0_i32_0 : i32, i32, i32
  }
  func.func @transform_1(%arg0: i32, %arg1: i32) -> (i32, i32) {
    %c0_i32 = arith.constant 0 : i32
    %c0_i32_0 = arith.constant 0 : i32
    %c0_i32_1 = arith.constant 0 : i32
    return %c0_i32, %c0_i32_0 : i32, i32
  }
  func.func @transform_2(%arg0: i32, %arg1: i32) -> (i32, i32) {
    %c0_i32 = arith.constant 0 : i32
    %c0_i32_0 = arith.constant 0 : i32
    %c0_i32_1 = arith.constant 0 : i32
    return %c0_i32, %c0_i32_0 : i32, i32
  }
  func.func @transform_3(%arg0: i32, %arg1: i32) -> (i32, i32) {
    %c0_i32 = arith.constant 0 : i32
    %c0_i32_0 = arith.constant 0 : i32
    %c0_i32_1 = arith.constant 0 : i32
    return %c0_i32, %c0_i32_0 : i32, i32
  }
  func.func @transform_4(%arg0: i32, %arg1: i32) -> (i32, i32) {
    %c0_i32 = arith.constant 0 : i32
    %c0_i32_0 = arith.constant 0 : i32
    %c0_i32_1 = arith.constant 0 : i32
    return %c0_i32, %c0_i32_0 : i32, i32
  }
  func.func @transform_5(%arg0: i32, %arg1: i32) -> (i32, i32) {
    %c0_i32 = arith.constant 0 : i32
    %c0_i32_0 = arith.constant 0 : i32
    %c0_i32_1 = arith.constant 0 : i32
    return %c0_i32, %c0_i32_0 : i32, i32
  }
  func.func @transform_6(%arg0: i32, %arg1: i32) -> (i32, i32) {
    %c0_i32 = arith.constant 0 : i32
    %c0_i32_0 = arith.constant 0 : i32
    %c0_i32_1 = arith.constant 0 : i32
    return %c0_i32, %c0_i32_0 : i32, i32
  }
  func.func @transform_7(%arg0: i32, %arg1: i32) -> (i32, i32, i32) {
    %c0_i32 = arith.constant 0 : i32
    %c0_i32_0 = arith.constant 0 : i32
    return %arg0, %arg1, %c0_i32 : i32, i32, i32
  }
}

</mosaic_0001>

<bundles_post_ra>
// kernel: tpu_custom_call.1
= control target key start
LH: loop header
LB: loop body
LE: loop exit
PB: predicated region body
PF: predicated region fallthrough
CT: control target
= control target key end

     0   :  { %s1859_s0 = inlined_call_operand.hbm [shape: f32[2,8,64], index: 0, kind: input, shape index: {}]   ;;  %s1860_s1 = inlined_call_operand.hbm [shape: f32[1,64], index: 1, kind: input, shape index: {}]   ;;  %s1861_s2 = inlined_call_operand.vmem [shape: f32[1,64], index: 2, kind: input, shape index: {}]   ;;  %s1862_s3 = inlined_call_operand.hbm [shape: bf16[64,192], index: 3, kind: input, shape index: {}]   ;;  %s1863_s4 = inlined_call_operand.vmem [shape: f32[1,192], index: 4, kind: input, shape index: {}]   ;;  %s1864_s5 = inlined_call_operand.hbm [shape: bf16[64,64], index: 5, kind: input, shape index: {}]   ;;  %s1865_s6 = inlined_call_operand.vmem [shape: f32[1,64], index: 6, kind: input, shape index: {}]   ;;  %s1866_s7 = inlined_call_operand.hbm [shape: f32[2,8,64], index: 7, kind: output, shape index: {}]  }
   0x1   :  { %1867 = sst [smem:[#allocation19_spill]] %s1860_s1 }
   0x2   :  { %1868 = sst [smem:[#allocation20_spill]] %s1862_s3 }
   0x3   :  { %1869 = sst [smem:[#allocation21_spill]] %s1864_s5 }
   0x4   :  { %12 = vsyncpa [#allocation7], 0 }
   0x5   :  { %14 = vsyncpa [#allocation7 + $0x1], 0 }
   0x6   :  { %15 = vsyncpa [#allocation10], 0 }
   0x7   :  { %16 = vsyncpa [#allocation13], 0 }
   0x8   :  { %17 = vsyncpa [#allocation8], 0 }
   0x9   :  { %19 = vsyncpa [#allocation8 + $0x1], 0  ;;  %s1580_s24 = smov 0   ;;  %s1582_s25 = smov 0  }
   0xa   :  { %s1584_s26 = smov 0   ;;  %s1586_s27 = smov 0  }
   0xb   :  { %s1588_s28 = smov 0   ;;  %s1590_s29 = smov 0  }
   0xc LB: > { %s1072_s30 = sadd.s32 4294967295, %s1523_s29   ;;  %s1073_s8 = sadd.s32 4294967294, %s1523_s29   ;;  %s1523_s29 = sphi %s1590_s29, %s25_s29   ;;  %s1519_s28 = sphi %s1588_s28, %s1885_s28   ;;  %s1515_s27 = sphi %s1586_s27, %s1884_s27   ;;  %s1511_s26 = sphi %s1584_s26, %s1883_s26   ;;  %s1507_s25 = sphi %s1582_s25, %s1882_s25   ;;  %s1503_s24 = sphi %s1580_s24, %s1881_s24  }
   0xd   : > { %p57_p0 = scmp.ne.s32.totalorder %s1507_s25, %s1503_s24  ;;  %p1614_p1 = scmp.eq.s32.totalorder %s1072_s30, 0 }
   0xe   : > { %p1618_p2 = scmp.eq.s32.totalorder %s1072_s30, 1  ;;  %p215_p3 = scmp.eq.s32.totalorder %s1073_s8, 1 }
   0xf   : > { %p1624_p4 = por %p1614_p1, %p57_p0  ;;  %p1074_p5 = scmp.ge.s32.totalorder %s1523_s29, 1 }
  0x10   : > { %p1629_p6 = por %p215_p3, %p57_p0  ;;  %p222_p7 = scmp.lt.s32.totalorder %s1523_s29, 3 }
  0x11   : > { %s1874_s1 = sld [smem:[#allocation19_spill]]  ;;  %p1078_p9 = scmp.ge.s32.totalorder %s1523_s29, 2 }
  0x12   : > { %p1637_p8 = pnand %p1074_p5, %p222_p7  ;;  %s1525_s17 = smov [#allocation9]  }
  0x13   : > { %s236_s18 = sshll.u32 %s1525_s17, 4  ;;  %s1876_s3 = sld [smem:[#allocation20_spill]]  ;;  %s237_s18 = int_to_ptr.vmem [resolvable:$true] %s236_s18 }
  0x14   : > { %p1198_p10 = pneg %p1637_p8  ;;  %s1526_s23 = smov [#allocation11]  }
  0x15   : > { %s250_s30 = sshll.u32 %s1526_s23, 4  ;;  %s1527_s8 = smov 128   ;;  %s251_s30 = int_to_ptr.vmem [resolvable:$true] %s250_s30 }
  0x16   : > { %p1649_p11 = pnand %p1198_p10, %p1614_p1  ;;  %s1528_s13 = smov 8  }
  0x17   : > { %s234_s15 = sshll.u32 %s1874_s1, 4  ;;  %s1878_s5 = sld [smem:[#allocation21_spill]]  ;;  %s235_s15 = int_to_ptr.hbm [resolvable:$true] %s234_s15 }
  0x18   : > { %1201 = dma.hbm_to_vmem [thread:$0]  (!%p1649_p11), %s235_s15, 16, %s237_s18, [#allocation10]  }
  0x19   : > { %s248_s21 = sshll.u32 %s1876_s3, 4  ;;  %s1529_s20 = smov [#allocation12]   ;;  %s249_s21 = int_to_ptr.hbm [resolvable:$true] %s248_s21 }
  0x1a   : > { %1204 = dma.hbm_to_vmem [thread:$0]  (!%p1649_p11), %s249_s21, 1024, %s251_s30, [#allocation10], %s1527_s8, %s1527_s8, %s1528_s13  }
  0x1b   : > { %s267_s23 = sshll.u32 %s1529_s20, 4  ;;  %s1530_s1 = smov 64   ;;  %s268_s23 = int_to_ptr.vmem [resolvable:$true] %s267_s23 }
  0x1c   : > { %s1531_s15 = smov 4   ;;  %s44_s18 = sadd.s32 1, %s1511_s26 }
  0x1d   : > { %s265_s19 = sshll.u32 %s1878_s5, 4  ;;  %s37_s3 = sadd.s32 1, %s1519_s28  ;;  %s266_s19 = int_to_ptr.hbm [resolvable:$true] %s265_s19 }
  0x1e   : > { %1207 = dma.hbm_to_vmem [thread:$0]  (!%p1649_p11), %s266_s19, 512, %s268_s23, [#allocation13], %s1530_s1, %s1530_s1, %s1531_s15  }
  0x1f   : > { %p51_p12 = scmp.ne.s32.totalorder %s1511_s26, %s1507_s25  ;;  %p39_p13 = scmp.ge.s32.totalorder %s37_s3, 2 }
  0x20   : > { %p52_p0 = scmp.eq.s32.totalorder %s1523_s29, 0  ;;  %p1219_p5 = scmp.lt.s32.totalorder %s1523_s29, 2 }
  0x21   : > { %p1669_p3 = por %p1618_p2, %p51_p12  ;;  %s1887_s3 = smov (%p39_p13, %s37_s3), 0 }
  0x22   : > { %p1676_p7 = por %p52_p0, %p51_p12  ;;  %s284_s1 = sand.u32 1, %s1511_s26  }
  0x23   : > { %s41_s22 = ssub.s32 %s1519_s28, %s1887_s3  ;;  %s1079_s8 = sshll.u32 %s284_s1, 3 }
  0x24   : > { %p42_p10 = scmp.eq.s32.totalorder %s41_s22, 0  ;;  %s1080_s13 = sshll.u32 %s1519_s28, 3 }
  0x25   : > { %s292_s19 = scalar_lea.hbm %s1859_s0, %s1080_s13  ;;  %s288_s20 = scalar_lea.vmem [#allocation6], %s1079_s8 }
  0x26   : > { %s1685_s10 = scalar_select %p42_p10, %s1511_s26, %s44_s18  }
  0x27   : > { %s296_s23 = sshll.u32 %s288_s20, 4  ;;  %s294_s15 = sshll.u32 %s292_s19, 4  ;;  %s297_s23 = int_to_ptr.vmem [resolvable:$true] %s296_s23  ;;  %s295_s15 = int_to_ptr.hbm [resolvable:$true] %s294_s15 }
  0x28   : > { %p1209_p2 = pnand %p1219_p5, %p1676_p7  ;;  %s285_s5 = scalar_lea.sflag [#allocation7], %s284_s1 }
  0x29   : > { %305 = sbr.rel (%p1637_p8) target bundleno = 1430 (0x596), region = 48  ;;  %s1697_s18 = sand.u32 (!%p1637_p8), 1, %s1507_s25  }
  0x2a   : > { %1211 = dma.hbm_to_vmem [thread:$0]  (!%p1209_p2), %s295_s15, 128, %s297_s23, %s285_s5  }
  0x2b   : > { %s1082_s22 = sshll.u32 (!%p1637_p8), %s1697_s18, 3  ;;  %s308_s8 = scalar_lea.sflag (!%p1637_p8), [#allocation7], %s1697_s18 }
  0x2c   : > { %s311_s13 = scalar_lea.vmem (!%p1637_p8), [#allocation6], %s1082_s22 }
  0x2e   : > { %1486 = dma.done.wait (%p1624_p4), %s308_s8, 128  }
  0x2f   : > { %1488 = vsyncadd (%p1624_p4), %s308_s8, 4294967168 }
  0x30   : > { %1490 = dma.done.wait (%p1614_p1), [#allocation10], 1040  }
  0x31   : > { %1492 = vsyncadd (%p1614_p1), [#allocation10], 4294966256 }
  0x32   : > { %1494 = dma.done.wait (%p1614_p1), [#allocation13], 512  }
  0x33   : > { %1496 = vsyncadd (%p1614_p1), [#allocation13], 4294966784  ;;  %vm366_vm0 = vcmask 523264   ;;  %v1715_v0 = vld [vmem:[%s311_s13] sm:$0xff]  ;;  %v1532_v2 = vmov 64.0   ;;  %s1533_s5 = smov 64  }
  0x34   : > { %v367_v1 = vsel %vm366_vm0, %v1715_v0, 0.0  ;;  %1291 = vrcp.f32 %v1532_v2  ;;  %v1113_v5 = vld [vmem:[#allocation11 + $0x30] sm:$0xf]  ;;  %v1173_v6 = vld [vmem:[#allocation11 + $0x34] sm:$0xf0]  ;;  %vm497_vm8 = vcmask 125952  }
  0x35   : > { %368 = vadd.xlane.f32.xlu0 %v367_v1  ;;  %v1114_v7 = vor.u32 %v1173_v6, %v1113_v5  ;;  %v1105_v8 = vld [vmem:[#allocation11 + $0x20] sm:$0xf]  ;;  %v1171_v9 = vld [vmem:[#allocation11 + $0x24] sm:$0xf0]  ;;  %v1172_v12 = vld [vmem:[#allocation11 + $0x34] sm:$0xf] }
  0x36   : > { %v1106_v11 = vor.u32 %v1171_v9, %v1105_v8  ;;  %v1115_v13 = vld [vmem:[#allocation11 + $0x38] sm:$0xf0]  ;;  %v1097_v25 = vld [vmem:[#allocation11 + $0x10] sm:$0xf]  ;;  %v1169_v26 = vld [vmem:[#allocation11 + $0x14] sm:$0xf0] }
  0x37   : > { %461 = vrot.lane.b32.xlu2 %v1114_v7, %s1533_s5  ;;  %v1118_v15 = vor.u32 %v1172_v12, %v1115_v13  ;;  %v1166_v27 = vld [vmem:[#allocation11 + $0x4] sm:$0xf]  ;;  %v1098_v28 = vor.u32 %v1169_v26, %v1097_v25  ;;  %v1091_v29 = vld [vmem:[#allocation11 + $0x8] sm:$0xf0]  ;;  %v1168_v33 = vld [vmem:[#allocation11 + $0x14] sm:$0xf] }
  0x38   : > { %v1094_v31 = vor.u32 %v1166_v27, %v1091_v29  ;;  %v1099_v34 = vld [vmem:[#allocation11 + $0x18] sm:$0xf0]  ;;  %v1089_v37 = vld [vmem:[#allocation11] sm:$0xf]  ;;  %v1167_v38 = vld [vmem:[#allocation11 + $0x4] sm:$0xf0] }
  0x39   : > { %v1102_v36 = vor.u32 %v1168_v33, %v1099_v34  ;;  %v1090_v39 = vor.u32 %v1167_v38, %v1089_v37  ;;  %v1170_v40 = vld [vmem:[#allocation11 + $0x24] sm:$0xf]  ;;  %v1107_v41 = vld [vmem:[#allocation11 + $0x28] sm:$0xf0]  ;;  %v1134_v46 = vld [vmem:[#allocation11 + $0x30] sm:$0xf] }
  0x3a   : > { %v1292_v3 = vpop.eup %1291  ;;  %v1110_v42 = vor.u32 %v1170_v40, %v1107_v41  ;;  %v1177_v47 = vld [vmem:[#allocation11 + $0x34] sm:$0xf0]  ;;  %v1130_v49 = vld [vmem:[#allocation11 + $0x20] sm:$0xf]  ;;  %v1176_v50 = vld [vmem:[#allocation11 + $0x24] sm:$0xf0] }
  0x3b   : > { %v371_v4 = vmul.f32 64.0, %v1292_v3  ;;  %vm375_vm1 = vweird.f32 %v1292_v3  ;;  %v1135_v48 = vor.u32 %v1177_v47, %v1134_v46  ;;  %v1131_v51 = vor.u32 %v1176_v50, %v1130_v49  ;;  %v1126_v52 = vld [vmem:[#allocation11 + $0x10] sm:$0xf]  ;;  %v1175_v53 = vld [vmem:[#allocation11 + $0x14] sm:$0xf0]  ;;  %s1534_s17 = smov 112  }
  0x3c   : > { %v1127_v54 = vor.u32 %v1175_v53, %v1126_v52  ;;  %v1122_v57 = vld [vmem:[#allocation11] sm:$0xf]  ;;  %v1174_v58 = vld [vmem:[#allocation11 + $0x4] sm:$0xf0]  ;;  %v1288_v27 = vld [vmem:[%s1861_s2] ss:$0 sm:$0xff] }
  0x3d   : > { %539 = vadd.xlane.f32.xlu0 %v367_v1  ;;  %v372_v10 = vsub.f32 1.0, %v371_v4  ;;  %619 = vmatpush.bf16.msra.mxu1 %v1135_v48  ;;  %v1123_v59 = vor.u32 %v1174_v58, %v1122_v57  ;;  %v1289_v37 = vld [vmem:[%s1863_s4] ss:$0 sm:$0xff]  ;;  %s1535_s19 = smov 96   ;;  %vm655_vm9 = vcmask 130048   ;;  %s1536_s20 = smov 80  }
  0x3e   : > { %vm736_vm10 = vcmask 64512   ;;  %s1537_s23 = smov 16   ;;  %s1538_s15 = smov 32   ;;  %vm792_vm11 = vcmask 1043456   ;;  %vm873_vm12 = vcmask 257152   ;;  %vm880_vm13 = vcmask 388352  }
  0x3f   : > { %v373_v14 = vmul.f32 %v1292_v3, %v372_v10  ;;  %463 = vrot.lane.b32.xlu2 %v1118_v15, %s1533_s5  ;;  %s1539_s8 = smov 48   ;;  %vm887_vm14 = vcmask 519552   ;;  %s1163_s13 = sshll.u32 %s1515_s27, 3 }
  0x40   : > { %s957_s11 = scalar_lea.hbm %s1866_s7, %s1163_s13  ;;  %s357_s1 = scalar_lea.vmem [#allocation14], %s1082_s22 }
  0x41   : > { %v374_v16 = vadd.f32 %v1292_v3, %v373_v14  ;;  %620 = vmatpush.bf16.msra.mxu1 %v1131_v51  ;;  %s959_s14 = sshll.u32 %s357_s1, 4  ;;  %s946_s27 = scalar_lea.sflag [#allocation8], %s1697_s18  ;;  %s960_s14 = int_to_ptr.vmem [resolvable:$true] %s959_s14 }
  0x42   : > { %s1453_s22 = scalar_lea.hbm %s1866_s7, 16 }
  0x43   : > { %v376_v17 = vsel %vm375_vm1, %v1292_v3, %v374_v16  ;;  %v413_v3 = vld [vmem:[%s1863_s4] sm:$0x3] }
  0x44   : > { %v416_v5 = vperm.slane %v413_v3, 1  ;;  %v415_v6 = vperm.slane %v413_v3, 0 }
  0x45   : > { %621 = vmatpush.bf16.msra.mxu1 %v1127_v54 }
  0x47   : > { %453 = vrot.lane.b32.xlu2 %v1098_v28, %s1533_s5 }
  0x49   : > { %622 = vmatpush.bf16.msra.mxu1 %v1123_v59 }
  0x4f   : > { %455 = vrot.lane.b32.xlu2 %v1102_v36, %s1533_s5 }
  0x51   : > { %457 = vrot.lane.b32.xlu0 %v1106_v11, %s1533_s5 }
  0x57   : > { %449 = vrot.lane.b32.xlu2 %v1090_v39, %s1533_s5 }
  0x59   : > { %451 = vrot.lane.b32.xlu0 %v1094_v31, %s1533_s5 }
  0x5f   : > { %474 = vrot.lane.b32.xlu2 %v415_v6, %s1533_s5 }
  0x91   : > { %v462_v43 = vpop.permute.xlu2 %461 }
  0x99   : > { %v464_v44 = vpop.permute.xlu2 %463 }
  0x9a   : > { %v469_v45 = vsel %vm366_vm0, %v462_v43, %v464_v44 }
  0x9b   : > { %487 = vmatpush.bf16.msra.mxu0 %v469_v45 }
  0xa1   : > { %v454_v8 = vpop.permute.xlu2 %453 }
  0xa8   : > { %v369_v18 = vpop.xlane.xlu0 %368 }
  0xa9   : > { %v377_v19 = vmul.f32 %v376_v17, %v369_v18 }
  0xab   : > { %v1723_v20 = vsub.f32 %v1715_v0, %v377_v19  ;;  %v456_v19 = vpop.permute.xlu2 %455 }
  0xac   : > { %v467_v34 = vsel %vm366_vm0, %v454_v8, %v456_v19 }
  0xad   : > { %v379_v21 = vmul.f32 %v1723_v20, %v1723_v20 }
  0xaf   : > { %v380_v22 = vsel %vm366_vm0, %v379_v21, 0.0 }
  0xb0   : > { %381 = vadd.xlane.f32.xlu1 %v380_v22  ;;  %v540_v23 = vpop.xlane.xlu0 %539  ;;  %v1287_v22 = vld [vmem:[#allocation9] ss:$0 sm:$0xff] }
  0xb1   : > { %v548_v24 = vmul.f32 %v540_v23, %v376_v17 }
  0xb3   : > { %v1729_v30 = vsub.f32 %v1715_v0, %v548_v24 }
  0xb5   : > { %v550_v32 = vmul.f32 %v1729_v30, %v1729_v30 }
  0xb7   : > { %v551_v35 = vsel %vm366_vm0, %v550_v32, 0.0  ;;  %v450_v32 = vpop.permute.xlu2 %449 }
  0xb8   : > { %552 = vadd.xlane.f32.xlu1 %v551_v35 }
  0xbf   : > { %v475_v40 = vpop.permute.xlu2 %474 }
  0xc3   : > { %v458_v16 = vpop.permute.xlu0 %457 }
  0xcb   : > { %v452_v33 = vpop.permute.xlu0 %451 }
  0xd1   : > { %459 = vrot.lane.b32.xlu1 %v1110_v42, %s1533_s5 }
  0xd9   : > { %476 = vrot.lane.b32.xlu1 %v416_v5, %s1533_s5 }
 0x123   : > { %v382_v55 = vpop.xlane.xlu1 %381 }
 0x124   : > { %v383_v56 = vmul.f32 %v382_v55, %v376_v17 }
 0x126   : > { %v384_v60 = vadd.f32 1e-05, %v383_v56 }
 0x128   : > { %1293 = vrsqrt.f32 %v384_v60  ;;  %vm391_vm3 = vweird.f32 %v384_v60 }
 0x12b   : > { %v553_v61 = vpop.xlane.xlu1 %552 }
 0x12c   : > { %v554_v62 = vmul.f32 %v553_v61, %v376_v17 }
 0x12e   : > { %v1294_v63 = vpop.eup %1293  ;;  %v555_v1 = vadd.f32 1e-05, %v554_v62 }
 0x12f   : > { %v386_v2 = vmul.f32 %v1294_v63, %v384_v60  ;;  %vm392_vm2 = vweird.f32 %v1294_v63 }
 0x130   : > { %1295 = vrsqrt.f32 %v555_v1  ;;  %vm393_vm5 = vmor %vm391_vm3, %vm392_vm2  ;;  %vm562_vm6 = vweird.f32 %v555_v1 }
 0x131   : > { %v387_v4 = vmul.f32 %v1294_v63, %v386_v2 }
 0x133   : > { %v388_v7 = vmul.f32 0.5, %v387_v4 }
 0x135   : > { %v389_v10 = vsub.f32 1.5, %v388_v7 }
 0x136   : > { %v1296_v9 = vpop.eup %1295 }
 0x137   : > { %v557_v11 = vmul.f32 %v1296_v9, %v555_v1  ;;  %v390_v13 = vmul.f32 %v1294_v63, %v389_v10  ;;  %vm563_vm4 = vweird.f32 %v1296_v9 }
 0x138   : > { %vm564_vm7 = vmor %vm562_vm6, %vm563_vm4 }
 0x139   : > { %v558_v12 = vmul.f32 %v1296_v9, %v557_v11  ;;  %v394_v17 = vsel %vm393_vm5, %v1294_v63, %v390_v13 }
 0x13a   : > { %v395_v24 = vmul.f32 %v394_v17, %v1723_v20  ;;  %v466_v20 = vsel %vm366_vm0, %v450_v32, %v452_v33 }
 0x13b   : > { %v559_v14 = vmul.f32 0.5, %v558_v12 }
 0x13c   : > { %v399_v31 = vmul.f32 %v1287_v22, %v395_v24 }
 0x13d   : > { %v560_v15 = vsub.f32 1.5, %v559_v14 }
 0x13f   : > { %v561_v18 = vmul.f32 %v1296_v9, %v560_v15 }
 0x141   : > { %v565_v21 = vsel %vm564_vm7, %v1296_v9, %v561_v18 }
 0x142   : > { %v566_v23 = vmul.f32 %v565_v21, %v1729_v30  ;;  %v403_v30 = vadd.f32 %v1288_v27, %v399_v31 }
 0x143   : > { %v460_v25 = vpop.permute.xlu1 %459 }
 0x144   : > { %v468_v26 = vsel %vm366_vm0, %v458_v16, %v460_v25  ;;  %v570_v28 = vmul.f32 %v1287_v22, %v566_v23  ;;  %v404_v36 = vpack.c.bf16 %v403_v30, %v403_v30 }
 0x145   : > { %488 = vmatpush.bf16.msra.mxu0 %v468_v26 }
 0x146   : > { %v574_v29 = vadd.f32 %v1288_v27, %v570_v28 }
 0x148   : > { %v575_v35 = vpack.c.bf16 %v574_v29, %v574_v29 }
 0x149   : > { %489 = vmatpush.bf16.msra.mxu0 %v467_v34 }
 0x14a   : > { %1136 = vmatmul.msk.bf16.vlgmr.msra.gmra.mxu1 %vm366_vm0, %v575_v35 }
 0x14b   : > { %v477_v41 = vpop.permute.xlu1 %476 }
 0x14c   : > { %v478_v43 = vsel %vm366_vm0, %v475_v40, %v477_v41 }
 0x14d   : > { %490 = vmatpush.bf16.msra.mxu0 %v466_v20 }
 0x150   : > { %1119 = vmatmul.msk.bf16.vlgmr.msra.gmra.mxu0 %vm366_vm0, %v404_v36 }
 0x1c7   : > { %v624_v38 = vpop.f32.mrf.mxu1 }
 0x1c8   : > { %v625_v39 = vadd.f32 %v1289_v37, %v624_v38 }
 0x1ca   : > { %v628_v42 = vpack.c.bf16 %v625_v39, %v625_v39 }
 0x1cc   : > { %630 = vst.msk [vmem:[#allocation4] sm:$0xf] %vm497_vm8, %v628_v42  ;;  %632 = vrot.lane.b32.xlu2 %v628_v42, %s1534_s17 }
 0x1cd   : > { %v492_v44 = vpop.f32.mrf.mxu0 }
 0x1ce   : > { %v493_v45 = vadd.f32 %v492_v44, %v478_v43 }
 0x1cf   : > { %v626_v46 = vpop.f32.mrf.mxu1 }
 0x1d0   : > { %v1760_v47 = vpack.c.bf16 %v493_v45, %v493_v45 }
 0x1d2   : > { %498 = vst.msk [vmem:[#allocation2] sm:$0xf] %vm497_vm8, %v1760_v47  ;;  %514 = vrot.lane.b32.xlu1 %v1760_v47, %s1535_s19  ;;  %504 = vrot.lane.b32.xlu0 %v1760_v47, %s1534_s17  ;;  %s961_s17 = sshll.u32 %s957_s11, 4  ;;  %s962_s17 = int_to_ptr.hbm [resolvable:$true] %s961_s17 }
 0x1d3   : > { %v647_v51 = vld [vmem:[#allocation4] sm:$0xf] }
 0x1d4   : > { %637 = vrot.lane.b32.xlu2 %v628_v42, %s1535_s19  ;;  %s1447_s19 = sshra.s32 %s962_s17, 4  ;;  %s1448_s19 = int_to_ptr.hbm [resolvable:$true] %s1447_s19 }
 0x1d5   : > { %v494_v48 = vpop.f32.mrf.mxu0  ;;  %p1454_p11 = scmp.lt.s32.totalorder %s1448_s19, %s1866_s7 }
 0x1d9   : > { %v651_v49 = vld [vmem:[#allocation2] sm:$0xf] }
 0x1da   : > { %642 = vrot.lane.b32.xlu1 %v628_v42, %s1536_s20  ;;  %524 = vrot.lane.b32.xlu0 %v1760_v47, %s1536_s20  ;;  %v660_v50 = vsel %vm655_vm9, %v651_v49, 0  ;;  %s1449_s20 = scalar_lea.hbm %s1448_s19, 8 }
 0x1db   : > { %669 = vmatpush.bf16.xpose.msra.mxu2 %v660_v50  ;;  %p1450_p1 = scmp.ne.s32.totalorder %s1448_s19, %s1449_s20  ;;  %p1455_p12 = scmp.lt.s32.totalorder %s1453_s22, %s1449_s20 }
 0x1dd   : > { %p1451_p4 = pnand %p1450_p1, %p1669_p3  ;;  %p1456_p13 = por %p1455_p12, %p1454_p11 }
 0x1df   : > { %p1452_p8 = pneg %p1451_p4 }
 0x1e1   : > { %p1457_p0 = pnand %p1456_p13, %p1452_p8 }
 0x1e2   : > { %1137 = vmatmul.msk.bf16.vlgmr.msra.gmra.mxu2 %vm655_vm9, %v647_v51 }
 0x226   : > { %v633_v52 = vpop.permute.xlu2 %632 }
 0x227   : > { %636 = vst.msk [vmem:[#allocation4 + $0x4] sm:$0xf] %vm497_vm8, %v633_v52 }
 0x22e   : > { %v638_v53 = vpop.permute.xlu2 %637  ;;  %v648_v63 = vld [vmem:[#allocation4 + $0x4] sm:$0xf] }
 0x22f   : > { %641 = vst.msk [vmem:[#allocation4 + $0x8] sm:$0xf] %vm497_vm8, %v638_v53 }
 0x236   : > { %v649_v62 = vld [vmem:[#allocation4 + $0x8] sm:$0xf] }
 0x244   : > { %v515_v54 = vpop.permute.xlu1 %514  ;;  %v505_v55 = vpop.permute.xlu0 %504 }
 0x245   : > { %518 = vst.msk [vmem:[#allocation2 + $0x8] sm:$0xf] %vm497_vm8, %v515_v54 }
 0x246   : > { %508 = vst.msk [vmem:[#allocation2 + $0x4] sm:$0xf] %vm497_vm8, %v505_v55 }
 0x24c   : > { %v643_v56 = vpop.permute.xlu1 %642  ;;  %v525_v57 = vpop.permute.xlu0 %524  ;;  %v653_v58 = vld [vmem:[#allocation2 + $0x8] sm:$0xf] }
 0x24d   : > { %646 = vst.msk [vmem:[#allocation4 + $0xc] sm:$0xf] %vm497_vm8, %v643_v56  ;;  %v652_v59 = vld [vmem:[#allocation2 + $0x4] sm:$0xf]  ;;  %v698_v60 = vsel %vm655_vm9, %v653_v58, 0 }
 0x24e   : > { %528 = vst.msk [vmem:[#allocation2 + $0xc] sm:$0xf] %vm497_vm8, %v525_v57  ;;  %v679_v61 = vsel %vm655_vm9, %v652_v59, 0  ;;  %707 = vmatpush.bf16.xpose.msrb.mxu2 %v698_v60 }
 0x24f   : > { %688 = vmatpush.bf16.xpose.msra.mxu3 %v679_v61 }
 0x254   : > { %v650_v4 = vld [vmem:[#allocation4 + $0xc] sm:$0xf] }
 0x255   : > { %1139 = vmatmul.msk.bf16.vlgmr.msrb.gmra.mxu2 %vm655_vm9, %v649_v62  ;;  %v654_v1 = vld [vmem:[#allocation2 + $0xc] sm:$0xf] }
 0x256   : > { %1138 = vmatmul.msk.bf16.vlgmr.msra.gmra.mxu3 %vm655_vm9, %v648_v63  ;;  %v717_v2 = vsel %vm655_vm9, %v654_v1, 0 }
 0x257   : > { %726 = vmatpush.bf16.xpose.msrb.mxu3 %v717_v2 }
 0x265   : > { %v671_v3 = vpop.f32.mrf.mxu2 }
 0x266   : > { %1140 = vmatmul.msk.bf16.vlgmr.msrb.gmra.mxu3 %vm655_vm9, %v650_v4  ;;  %v732_v12 = vmul.f32 0.25, %v671_v3 }
 0x268   : > { %v737_v15 = vsel %vm736_vm10, %v732_v12, -inf }
 0x26d   : > { %v673_v5 = vpop.f32.mrf.mxu2 }
 0x2d8   : > { %v709_v6 = vpop.f32.mrf.mxu2 }
 0x2d9   : > { %v690_v7 = vpop.f32.mrf.mxu3  ;;  %v734_v8 = vmul.f32 0.25, %v709_v6 }
 0x2da   : > { %v733_v9 = vmul.f32 0.25, %v690_v7 }
 0x2db   : > { %v743_v10 = vsel %vm736_vm10, %v734_v8, -inf }
 0x2dc   : > { %v740_v11 = vsel %vm736_vm10, %v733_v9, -inf  ;;  %744 = vmax.xlane.f32.xlu0 %v743_v10 }
 0x2dd   : > { %741 = vmax.xlane.f32.xlu1 %v740_v11 }
 0x2e0   : > { %v711_v13 = vpop.f32.mrf.mxu2 }
 0x2e1   : > { %v692_v14 = vpop.f32.mrf.mxu3 }
 0x2e4   : > { %738 = vmax.xlane.f32.xlu0 %v737_v15 }
 0x2e9   : > { %v728_v16 = vpop.f32.mrf.mxu3 }
 0x2ea   : > { %v735_v17 = vmul.f32 0.25, %v728_v16 }
 0x2ec   : > { %v746_v18 = vsel %vm736_vm10, %v735_v17, -inf }
 0x2ed   : > { %747 = vmax.xlane.f32.xlu2 %v746_v18  ;;  %v1180_v18 = vld [vmem:[#allocation12 + $0x10] sm:$0xff] }
 0x2f1   : > { %v730_v19 = vpop.f32.mrf.mxu3 }
 0x2f2   : > { %v1179_v19 = vld [vmem:[#allocation12 + $0x8] sm:$0xff] }
 0x2f8   : > { %529 = vrot.lane.b32.xlu0 %v1760_v47, %s1537_s23 }
 0x300   : > { %500 = vrot.lane.b32.xlu0 %v1760_v47, %s1533_s5 }
 0x305   : > { %519 = vrot.lane.b32.xlu2 %v1760_v47, %s1538_s15 }
 0x34f   : > { %v745_v21 = vpop.xlane.xlu0 %744 }
 0x350   : > { %v742_v22 = vpop.xlane.xlu1 %741  ;;  %v751_v23 = vsub.f32 %v734_v8, %v745_v21  ;;  %v1178_v21 = vld [vmem:[#allocation12] sm:$0xff] }
 0x351   : > { %v750_v24 = vsub.f32 %v733_v9, %v742_v22 }
 0x352   : > { %v757_v25 = vmul.f32 1.442695, %v751_v23 }
 0x353   : > { %v755_v26 = vmul.f32 1.442695, %v750_v24 }
 0x354   : > { %1297 = vpow2.f32 %v757_v25 }
 0x355   : > { %1299 = vpow2.f32 %v755_v26  ;;  %v1290_v26 = vld [vmem:[%s1865_s6] ss:$0 sm:$0xff] }
 0x357   : > { %v739_v27 = vpop.xlane.xlu0 %738 }
 0x358   : > { %v749_v28 = vsub.f32 %v732_v12, %v739_v27 }
 0x35a   : > { %v1298_v29 = vpop.eup %1297  ;;  %v753_v31 = vmul.f32 1.442695, %v749_v28 }
 0x35b   : > { %v1300_v32 = vpop.eup %1299  ;;  %v767_v33 = vsel %vm736_vm10, %v1298_v29, 0.0 }
 0x35c   : > { %1301 = vpow2.f32 %v753_v31  ;;  %v764_v34 = vsel %vm736_vm10, %v1300_v32, 0.0  ;;  %768 = vadd.xlane.f32.xlu1 %v767_v33 }
 0x35d   : > { %765 = vadd.xlane.f32.xlu2 %v764_v34 }
 0x360   : > { %v748_v35 = vpop.xlane.xlu2 %747 }
 0x361   : > { %v752_v20 = vsub.f32 %v735_v17, %v748_v35  ;;  %v1181_v17 = vld [vmem:[#allocation12 + $0x18] sm:$0xff] }
 0x362   : > { %v1302_v30 = vpop.eup %1301 }
 0x363   : > { %v759_v36 = vmul.f32 1.442695, %v752_v20  ;;  %v761_v37 = vsel %vm736_vm10, %v1302_v30, 0.0 }
 0x364   : > { %762 = vadd.xlane.f32.xlu0 %v761_v37 }
 0x365   : > { %1303 = vpow2.f32 %v759_v36 }
 0x368   : > { %v520_v38 = vpop.permute.xlu2 %519 }
 0x369   : > { %523 = vst.msk [vmem:[#allocation3 + $0x8] sm:$0xf] %vm497_vm8, %v520_v38 }
 0x36a   : > { %v530_v39 = vpop.permute.xlu0 %529 }
 0x36b   : > { %v1304_v40 = vpop.eup %1303  ;;  %533 = vst.msk [vmem:[#allocation3 + $0xc] sm:$0xf] %vm497_vm8, %v530_v39 }
 0x36c   : > { %v770_v41 = vsel %vm736_vm10, %v1304_v40, 0.0 }
 0x36d   : > { %771 = vadd.xlane.f32.xlu1 %v770_v41 }
 0x370   : > { %v787_v42 = vld [vmem:[#allocation3 + $0x8] sm:$0xf] }
 0x371   : > { %v832_v43 = vsel %vm792_vm11, %v787_v42, 0 }
 0x372   : > { %841 = vmatpush.bf16.msra.mxu2 %v832_v43  ;;  %v501_v44 = vpop.permute.xlu0 %500  ;;  %v788_v45 = vld [vmem:[#allocation3 + $0xc] sm:$0xf] }
 0x373   : > { %503 = vst.msk [vmem:[#allocation3] sm:$0xf] %vm497_vm8, %v501_v44  ;;  %v851_v46 = vsel %vm792_vm11, %v788_v45, 0 }
 0x374   : > { %860 = vmatpush.bf16.msra.mxu3 %v851_v46 }
 0x37a   : > { %v785_v48 = vld [vmem:[#allocation3] sm:$0xf] }
 0x37b   : > { %v794_v49 = vsel %vm792_vm11, %v785_v48, 0 }
 0x37c   : > { %803 = vmatpush.bf16.msrb.mxu0 %v794_v49 }
 0x380   : > { %929 = vmatpush.bf16.msra.mxu0 %v1181_v17 }
 0x384   : > { %930 = vmatpush.bf16.msra.mxu0 %v1180_v18 }
 0x386   : > { %509 = vrot.lane.b32.xlu1 %v1760_v47, %s1539_s8 }
 0x388   : > { %931 = vmatpush.bf16.msra.mxu0 %v1179_v19 }
 0x38c   : > { %932 = vmatpush.bf16.msra.mxu0 %v1178_v21 }
 0x3cf   : > { %v769_v50 = vpop.xlane.xlu1 %768 }
 0x3d0   : > { %1305 = vrcp.f32 %v769_v50  ;;  %v766_v47 = vpop.xlane.xlu2 %765 }
 0x3d6   : > { %v1306_v51 = vpop.eup %1305 }
 0x3d7   : > { %v779_v52 = vmul.f32 %v1306_v51, %v1298_v29  ;;  %v763_v53 = vpop.xlane.xlu0 %762 }
 0x3d8   : > { %1307 = vrcp.f32 %v763_v53 }
 0x3d9   : > { %v783_v54 = vpack.c.bf16 %v779_v52, %v779_v52 }
 0x3db   : > { %1143 = vmatmul.msk.bf16.vlgmr.msra.gmra.mxu2 %vm736_vm10, %v783_v54 }
 0x3de   : > { %v1308_v55 = vpop.eup %1307 }
 0x3df   : > { %v777_v56 = vmul.f32 %v1308_v55, %v1302_v30 }
 0x3e0   : > { %v772_v57 = vpop.xlane.xlu1 %771 }
 0x3e1   : > { %v781_v58 = vpack.c.bf16 %v777_v56, %v777_v56  ;;  %1309 = vrcp.f32 %v772_v57 }
 0x3e2   : > { %1311 = vrcp.f32 %v766_v47 }
 0x3e3   : > { %1141 = vmatmul.msk.bf16.vlgmr.msrb.gmra.mxu0 %vm736_vm10, %v781_v58 }
 0x3e7   : > { %v1310_v59 = vpop.eup %1309 }
 0x3e8   : > { %v780_v60 = vmul.f32 %v1310_v59, %v1304_v40  ;;  %v1312_v63 = vpop.eup %1311 }
 0x3e9   : > { %v778_v1 = vmul.f32 %v1312_v63, %v1300_v32 }
 0x3ea   : > { %v784_v61 = vpack.c.bf16 %v780_v60, %v780_v60 }
 0x3eb   : > { %v782_v4 = vpack.c.bf16 %v778_v1, %v778_v1 }
 0x3ec   : > { %1144 = vmatmul.msk.bf16.vlgmr.msra.gmra.mxu3 %vm736_vm10, %v784_v61 }
 0x3f8   : > { %v510_v62 = vpop.permute.xlu1 %509 }
 0x3f9   : > { %513 = vst.msk [vmem:[#allocation3 + $0x4] sm:$0xf] %vm497_vm8, %v510_v62 }
 0x400   : > { %v786_v2 = vld [vmem:[#allocation3 + $0x4] sm:$0xf] }
 0x401   : > { %v813_v3 = vsel %vm792_vm11, %v786_v2, 0 }
 0x402   : > { %822 = vmatpush.bf16.msrb.mxu1 %v813_v3 }
 0x405   : > { %1142 = vmatmul.msk.bf16.vlgmr.msrb.gmra.mxu1 %vm736_vm10, %v782_v4 }
 0x45e   : > { %v843_v5 = vpop.f32.mrf.mxu2 }
 0x45f   : > { %v875_v15 = vpack.c.bf16 %v843_v5, %v843_v5 }
 0x460   : > { %v805_v6 = vpop.f32.mrf.mxu0 }
 0x461   : > { %v866_v7 = vpack.c.bf16 %v805_v6, %v805_v6 }
 0x463   : > { %867 = vst.msk [vmem:[#allocation5] sm:$0xf] %vm497_vm8, %v866_v7 }
 0x466   : > { %v845_v8 = vpop.f32.mrf.mxu2 }
 0x468   : > { %v807_v9 = vpop.f32.mrf.mxu0 }
 0x46f   : > { %v862_v10 = vpop.f32.mrf.mxu3 }
 0x470   : > { %v882_v16 = vpack.c.bf16 %v862_v10, %v862_v10 }
 0x477   : > { %v864_v11 = vpop.f32.mrf.mxu3 }
 0x482   : > { %v824_v12 = vpop.f32.mrf.mxu1 }
 0x483   : > { %v868_v13 = vpack.c.bf16 %v824_v12, %v824_v12 }
 0x485   : > { %870 = vrot.lane.b32.xlu1 %v868_v13, %s1537_s23 }
 0x48a   : > { %v826_v14 = vpop.f32.mrf.mxu1 }
 0x48d   : > { %877 = vrot.lane.b32.xlu1 %v875_v15, %s1538_s15 }
 0x495   : > { %884 = vrot.lane.b32.xlu1 %v882_v16, %s1539_s8 }
 0x4f7   : > { %v871_v22 = vpop.permute.xlu1 %870 }
 0x4f8   : > { %874 = vst.msk [vmem:[#allocation5] sm:$0xf] %vm873_vm12, %v871_v22 }
 0x4ff   : > { %v878_v23 = vpop.permute.xlu1 %877 }
 0x500   : > { %881 = vst.msk [vmem:[#allocation5] sm:$0xf] %vm880_vm13, %v878_v23 }
 0x507   : > { %v885_v24 = vpop.permute.xlu1 %884 }
 0x508   : > { %888 = vst.msk [vmem:[#allocation5] sm:$0xf] %vm887_vm14, %v885_v24 }
 0x50f   : > { %v889_v25 = vld [vmem:[#allocation5] sm:$0xf] }
 0x510   : > { %1161 = vmatmul.msk.bf16.vlgmr.msra.gmra.mxu0 %vm366_vm0, %v889_v25 }
 0x58d   : > { %v934_v27 = vpop.f32.mrf.mxu0 }
 0x58e   : > { %v938_v28 = vadd.f32 %v934_v27, %v1715_v0 }
 0x590   : > { %v943_v29 = vadd.f32 %v1290_v26, %v938_v28 }
 0x592   : > { %944 = vst.msk [vmem:[%s357_s1] sm:$0xff] %vm366_vm0, %v943_v29 }
 0x593   : > { %1460 = shalt.err (!%p1457_p0)
}
 0x594   : > { %1196 = dma.vmem_to_hbm [thread:$0]  (%p1669_p3), %s960_s14, 128, %s962_s17, %s946_s27  }
 0x595   : > { %v936_v0 = vpop.f32.mrf.mxu0 }
 0x596 PF: > { %s973_s18 = sand.u32 1, %s1503_s24   ;;  %p1213_p5 = pnand %p1078_p9, %p1629_p6 }
 0x597   : > { %s974_s5 = scalar_lea.sflag [#allocation8], %s973_s18 }
 0x598   : > { %p1214_p7 = pneg %p1213_p5 }
 0x59a   : > { %1498 = dma.done.wait (%p1214_p7), %s974_s5, 128  }
 0x59b   : > { %1500 = vsyncadd (%p1214_p7), %s974_s5, 4294967168  ;;  %s25_s29 = sadd.s32 1, %s1523_s29   ;;  %s1881_s24 = smov %s1507_s25 }
 0x59c   : > { %p22_p10 = scmp.ge.s32.totalorder %s25_s29, 4   ;;  %s1882_s25 = smov %s1511_s26 }
 0x59d   : > { %s1883_s26 = smov %s1685_s10  ;;  %s1884_s27 = smov %s1519_s28 }
 0x59e   : > { %s1885_s28 = smov %s1887_s3  ;;  %24 = sbr.rel (!%p22_p10) target bundleno = 12 (0xc), region = 119 }
 0x5a3   :  { %980 = vsyncpa [#allocation7], 1 }
 0x5a4   :  { %982 = vsyncpa [#allocation7 + $0x1], 1 }
 0x5a5   :  { %983 = vsyncpa [#allocation10], 1 }
 0x5a6   :  { %984 = vsyncpa [#allocation13], 1 }
 0x5a7   :  { %985 = vsyncpa [#allocation8], 1 }
 0x5a8   :  { %987 = vsyncpa [#allocation8 + $0x1], 1 }

</bundles_post_ra>
